<compile_context>
chip_gen: v7x
topology: tpu7x:2x2x1
jax: 0.10.0
libtpu: 0.0.40
codegen_flags: <defaults>
</compile_context>

<pallas_src>
import functools

import jax
import jax.numpy as jnp
from jax.experimental import pallas as pl
from jax.experimental.pallas import tpu as pltpu

_LANE = 128      # lane width; L tiles are multiples of this when L allows
_SUBLANE = 8     # sublane granularity for channel padding


def _round_up(x, m):
    return (x + m - 1) // m * m


# ------------------------------- Pallas kernel -------------------------------

def _mlp_kernel(*refs, num_layers):
    """Fused per-point MLP over one (batch element, L-tile) block.

    refs = (x_ref, w0, b0, w1, b1, ..., w{L-1}, b{L-1}, out_ref)
      x_ref : (C_in, tL)          f32  (cast to bf16 on first load)
      w_i   : (C_{i+1}p, C_i p)   bf16 (full array, VMEM-resident)
      b_i   : (C_{i+1}p, 1)       f32
      out   : (num_classes, tL)   f32
    ReLU after every layer except the last (matches the PyTorch module).
    """
    x_ref, out_ref, wb = refs[0], refs[-1], refs[1:-1]

    h = x_ref[...].astype(jnp.bfloat16)                           # (C_in, tL) bf16
    for i in range(num_layers):
        w = wb[2 * i][...]                                         # bf16
        b = wb[2 * i + 1][...]                                     # f32
        acc = jnp.dot(w, h, preferred_element_type=jnp.float32)    # MXU, f32 acc
        acc = acc + b                                              # f32 bias epilogue
        if i < num_layers - 1:
            h = jnp.maximum(acc, 0.0).astype(jnp.bfloat16)         # ReLU, bf16 carry
        else:
            out_ref[...] = acc.astype(out_ref.dtype)               # final layer: no ReLU


# ----------------------------- one-time param prep ----------------------------

def prepare_params(weights, biases):
    """One-time conversion of PyTorch Conv1d(k=1) params to the kernel layout.

    Weights become bf16 with output channels padded to a sublane multiple (8),
    except the final layer, which stays at num_classes so the kernel writes the
    unpadded NCL output directly.  Input channels of layer i are padded to match
    layer i-1's padded width.  Padded rows/cols are zero and ReLU(0) = 0, so the
    maths are unchanged.
    """
    num_layers = len(weights)
    params = []
    cin_p = int(weights[0].shape[1])              # first layer contracts true C_in
    for i, (w, b) in enumerate(zip(weights, biases)):
        cout, cin = int(w.shape[0]), int(w.shape[1])
        cout_p = cout if i == num_layers - 1 else _round_up(cout, _SUBLANE)
        wp = jnp.zeros((cout_p, cin_p), jnp.bfloat16).at[:cout, :cin].set(
            w.astype(jnp.bfloat16))
        bp = jnp.zeros((cout_p, 1), jnp.float32).at[:cout, 0].set(
            b.astype(jnp.float32))
        params += [wp, bp]
        cin_p = cout_p
    return tuple(params)


def _vmem_budget(params, cin, num_classes, tl):
    """Explicit VMEM budget (bytes) for the fused call; see header comments."""
    num_layers = len(params) // 2
    w_bytes = sum(int(params[2 * i].size) * 2 for i in range(num_layers))       # bf16, single-buffered
    b_bytes = sum(int(params[2 * i + 1].size) * 4 for i in range(num_layers))   # f32
    io_bytes = 2 * (cin * tl * 4) + 2 * (num_classes * tl * 4)                   # double-buffered x / out tiles
    widest = max(int(p.shape[0]) for p in params[0::2])
    act_bytes = 4 * widest * tl * 4                                              # f32 acc + bf16 carries + slack
    need = w_bytes + b_bytes + io_bytes + act_bytes + (2 << 20)
    return int(min(max(need, 32 << 20), 64 << 20))                               # >=32 MiB (v5e), <=64 MiB (v7x)


# --------------------------------- wrapper -----------------------------------

def mlp_forward(x, params):
    """Forward of the PyTorch MLP module, fully fused into one pallas_call.

    x      : (N, C_in, L) float32 (Conv1d NCL layout)
    params : output of prepare_params() -- (w0, b0, w1, b1, ...)
    Returns (N, num_classes, L) float32 (NCL), no wrapper-side layout passes.
    """
    n, cin, length = x.shape
    num_layers = len(params) // 2
    num_classes = int(params[-2].shape[0])

    # L tile: big spatial axis on lanes.  128-aligned tiles up to 1024 when L
    # allows (mem-bound sweet spot); otherwise the full L extent (always legal).
    tl = min(1024, length) if length % _LANE == 0 else length
    n_l_tiles = pl.cdiv(length, tl)

    vmem_bytes = _vmem_budget(params, cin, num_classes, tl)
    kernel = functools.partial(_mlp_kernel, num_layers=num_layers)
    out_shape = jax.ShapeDtypeStruct((n, num_classes, length), x.dtype)

    def run(single_buffer_weights):
        wb_kwargs = ({"pipeline_mode": pl.Buffered(1)}
                     if single_buffer_weights else {})
        # x read directly in NCL: one batch element, one L tile per grid step.
        in_specs = [pl.BlockSpec((None, cin, tl), lambda nb, lb: (nb, 0, lb))]
        for i in range(num_layers):
            w, b = params[2 * i], params[2 * i + 1]
            # whole weight / bias arrays resident in VMEM across all grid steps
            in_specs.append(pl.BlockSpec(tuple(w.shape), lambda nb, lb: (0, 0),
                                         **wb_kwargs))
            in_specs.append(pl.BlockSpec(tuple(b.shape), lambda nb, lb: (0, 0),
                                         **wb_kwargs))
        out_spec = pl.BlockSpec((None, num_classes, tl), lambda nb, lb: (nb, 0, lb))

        return pl.pallas_call(
            kernel,
            out_shape=out_shape,
            grid=(n, n_l_tiles),
            in_specs=in_specs,
            out_specs=out_spec,
            compiler_params=pltpu.CompilerParams(
                dimension_semantics=("parallel", "parallel"),
                vmem_limit_bytes=vmem_bytes),
        )(x, *params)

    try:
        return run(single_buffer_weights=True)
    except Exception:
        # Fallback: default double-buffering of the (tiny) resident weights if
        # pl.Buffered(1) is not accepted by this jax/Mosaic version.
        return run(single_buffer_weights=False)


# ----------------------------------- main -------------------------------------

if __name__ == "__main__":
    # MLP(fc_dim_in=4, fc_dims=[32, 64], num_classes=3), input (N=2, C=4, L=16)
    fc_dim_in, fc_dims, num_classes = 4, (32, 64), 3
    n, length = 2, 16

    key = jax.random.PRNGKey(0)
    keys = jax.random.split(key, 2 * (len(fc_dims) + 1) + 1)

    x = jax.random.normal(keys[0], (n, fc_dim_in, length), jnp.float32)

    weights, biases = [], []
    cin, ki = fc_dim_in, 1
    for cout in list(fc_dims) + [num_classes]:
        bound = 1.0 / (cin ** 0.5)   # PyTorch Conv1d default init range
        weights.append(jax.random.uniform(keys[ki], (cout, cin), jnp.float32,
                                          -bound, bound))
        biases.append(jax.random.uniform(keys[ki + 1], (cout,), jnp.float32,
                                         -bound, bound))
        cin, ki = cout, ki + 2

    params = prepare_params(weights, biases)     # one-time bf16/padded packing

    out = mlp_forward(x, params)                 # single fused Pallas kernel
    out = jax.block_until_ready(out)

    # pure-JAX f32 reference of the PyTorch module (NCL in, NCL out)
    def ref(xv, ws, bs):
        h = xv
        for i, (w, b) in enumerate(zip(ws, bs)):
            h = jnp.einsum("oc,ncl->nol", w, h) + b[None, :, None]
            if i < len(ws) - 1:
                h = jnp.maximum(h, 0.0)
        return h

    expected = ref(x, weights, biases)

    assert out.shape == (n, num_classes, length), out.shape
    assert bool(jnp.all(jnp.isfinite(out)))
    err = float(jnp.max(jnp.abs(out - expected)))
    assert err < 1e-1, err   # bf16 MXU operands, f32 accumulation
    print("KERNEL_OK")
</pallas_src>

<mosaic_0001>
module attributes {stable_mosaic.version = 11 : i64} {
  func.func @_mlp_kernel(%arg0: i32, %arg1: i32, %arg2: memref<1x4x16xf32, #tpu.memory_space<vmem>>, %arg3: memref<32x4xbf16, #tpu.memory_space<vmem>>, %arg4: memref<32x1xf32, #tpu.memory_space<vmem>>, %arg5: memref<64x32xbf16, #tpu.memory_space<vmem>>, %arg6: memref<64x1xf32, #tpu.memory_space<vmem>>, %arg7: memref<3x64xbf16, #tpu.memory_space<vmem>>, %arg8: memref<3x1xf32, #tpu.memory_space<vmem>>, %arg9: memref<1x3x16xf32, #tpu.memory_space<vmem>>) attributes {dimension_semantics = [#tpu.dimension_semantics<parallel>, #tpu.dimension_semantics<parallel>], iteration_bounds = array<i64: 2, 1>, scalar_prefetch = 0 : i64, scratch_operands = 0 : i64, tpu.core_type = #tpu.core_type<tc>, window_params = [{transform_indices = @transform_0, window_bounds = array<i64: 1, 4, 16>}, {pipeline_mode = #tpu.pipeline_mode<synchronous>, transform_indices = @transform_1, window_bounds = array<i64: 32, 4>}, {pipeline_mode = #tpu.pipeline_mode<synchronous>, transform_indices = @transform_2, window_bounds = array<i64: 32, 1>}, {pipeline_mode = #tpu.pipeline_mode<synchronous>, transform_indices = @transform_3, window_bounds = array<i64: 64, 32>}, {pipeline_mode = #tpu.pipeline_mode<synchronous>, transform_indices = @transform_4, window_bounds = array<i64: 64, 1>}, {pipeline_mode = #tpu.pipeline_mode<synchronous>, transform_indices = @transform_5, window_bounds = array<i64: 3, 64>}, {pipeline_mode = #tpu.pipeline_mode<synchronous>, transform_indices = @transform_6, window_bounds = array<i64: 3, 1>}, {transform_indices = @transform_7, window_bounds = array<i64: 1, 3, 16>}]} {
    %c0 = arith.constant 0 : index
    %c0_0 = arith.constant 0 : index
    %c0_1 = arith.constant 0 : index
    %0 = vector.load %arg2[%c0, %c0_0, %c0_1] : memref<1x4x16xf32, #tpu.memory_space<vmem>>, vector<1x4x16xf32>
    %1 = vector.shape_cast %0 : vector<1x4x16xf32> to vector<4x16xf32>
    %2 = arith.truncf %1 : vector<4x16xf32> to vector<4x16xbf16>
    %c0_2 = arith.constant 0 : index
    %c0_3 = arith.constant 0 : index
    %3 = vector.load %arg3[%c0_2, %c0_3] : memref<32x4xbf16, #tpu.memory_space<vmem>>, vector<32x4xbf16>
    %c0_4 = arith.constant 0 : index
    %c0_5 = arith.constant 0 : index
    %4 = vector.load %arg4[%c0_4, %c0_5] : memref<32x1xf32, #tpu.memory_space<vmem>>, vector<32x1xf32>
    %cst = arith.constant dense<0.000000e+00> : vector<32x16xf32>
    %5 = tpu.matmul %3, %2, %cst {dimension_numbers = #tpu.dot_dimension_numbers<[1], [0], [0], [1], [0, 0, 1, 1], [], []>} : vector<32x4xbf16>, vector<4x16xbf16>, vector<32x16xf32> -> vector<32x16xf32>
    %6 = vector.broadcast %4 : vector<32x1xf32> to vector<32x16xf32>
    %7 = arith.addf %5, %6 : vector<32x16xf32>
    %cst_6 = arith.constant 0.000000e+00 : f32
    %8 = vector.broadcast %cst_6 : f32 to vector<32x16xf32>
    %9 = arith.maximumf %7, %8 : vector<32x16xf32>
    %10 = arith.truncf %9 : vector<32x16xf32> to vector<32x16xbf16>
    %c0_7 = arith.constant 0 : index
    %c0_8 = arith.constant 0 : index
    %11 = vector.load %arg5[%c0_7, %c0_8] : memref<64x32xbf16, #tpu.memory_space<vmem>>, vector<64x32xbf16>
    %c0_9 = arith.constant 0 : index
    %c0_10 = arith.constant 0 : index
    %12 = vector.load %arg6[%c0_9, %c0_10] : memref<64x1xf32, #tpu.memory_space<vmem>>, vector<64x1xf32>
    %cst_11 = arith.constant dense<0.000000e+00> : vector<64x16xf32>
    %13 = tpu.matmul %11, %10, %cst_11 {dimension_numbers = #tpu.dot_dimension_numbers<[1], [0], [0], [1], [0, 0, 1, 1], [], []>} : vector<64x32xbf16>, vector<32x16xbf16>, vector<64x16xf32> -> vector<64x16xf32>
    %14 = vector.broadcast %12 : vector<64x1xf32> to vector<64x16xf32>
    %15 = arith.addf %13, %14 : vector<64x16xf32>
    %cst_12 = arith.constant 0.000000e+00 : f32
    %16 = vector.broadcast %cst_12 : f32 to vector<64x16xf32>
    %17 = arith.maximumf %15, %16 : vector<64x16xf32>
    %18 = arith.truncf %17 : vector<64x16xf32> to vector<64x16xbf16>
    %c0_13 = arith.constant 0 : index
    %c0_14 = arith.constant 0 : index
    %19 = vector.load %arg7[%c0_13, %c0_14] : memref<3x64xbf16, #tpu.memory_space<vmem>>, vector<3x64xbf16>
    %c0_15 = arith.constant 0 : index
    %c0_16 = arith.constant 0 : index
    %20 = vector.load %arg8[%c0_15, %c0_16] : memref<3x1xf32, #tpu.memory_space<vmem>>, vector<3x1xf32>
    %cst_17 = arith.constant dense<0.000000e+00> : vector<3x16xf32>
    %21 = tpu.matmul %19, %18, %cst_17 {dimension_numbers = #tpu.dot_dimension_numbers<[1], [0], [0], [1], [0, 0, 1, 1], [], []>} : vector<3x64xbf16>, vector<64x16xbf16>, vector<3x16xf32> -> vector<3x16xf32>
    %22 = vector.broadcast %20 : vector<3x1xf32> to vector<3x16xf32>
    %23 = arith.addf %21, %22 : vector<3x16xf32>
    %c0_18 = arith.constant 0 : index
    %c0_19 = arith.constant 0 : index
    %c0_20 = arith.constant 0 : index
    %24 = vector.load %arg9[%c0_18, %c0_19, %c0_20] : memref<1x3x16xf32, #tpu.memory_space<vmem>>, vector<1x3x16xf32>
    %25 = vector.shape_cast %24 : vector<1x3x16xf32> to vector<3x16xf32>
    %26 = vector.shape_cast %23 : vector<3x16xf32> to vector<1x3x16xf32>
    tpu.vector_store %arg9[%c0_18, %c0_19, %c0_20], %26 {strides = array<i32>} : memref<1x3x16xf32, #tpu.memory_space<vmem>>, vector<1x3x16xf32>,
    return
  }
  func.func @transform_0(%arg0: i32, %arg1: i32) -> (i32, i32, i32) {
    %c0_i32 = arith.constant 0 : i32
    %c0_i32_0 = arith.constant 0 : i32
    return %arg0, %c0_i32, %arg1 : i32, i32, i32
  }
  func.func @transform_1(%arg0: i32, %arg1: i32) -> (i32, i32) {
    %c0_i32 = arith.constant 0 : i32
    %c0_i32_0 = arith.constant 0 : i32
    %c0_i32_1 = arith.constant 0 : i32
    return %c0_i32, %c0_i32_0 : i32, i32
  }
  func.func @transform_2(%arg0: i32, %arg1: i32) -> (i32, i32) {
    %c0_i32 = arith.constant 0 : i32
    %c0_i32_0 = arith.constant 0 : i32
    %c0_i32_1 = arith.constant 0 : i32
    return %c0_i32, %c0_i32_0 : i32, i32
  }
  func.func @transform_3(%arg0: i32, %arg1: i32) -> (i32, i32) {
    %c0_i32 = arith.constant 0 : i32
    %c0_i32_0 = arith.constant 0 : i32
    %c0_i32_1 = arith.constant 0 : i32
    return %c0_i32, %c0_i32_0 : i32, i32
  }
  func.func @transform_4(%arg0: i32, %arg1: i32) -> (i32, i32) {
    %c0_i32 = arith.constant 0 : i32
    %c0_i32_0 = arith.constant 0 : i32
    %c0_i32_1 = arith.constant 0 : i32
    return %c0_i32, %c0_i32_0 : i32, i32
  }
  func.func @transform_5(%arg0: i32, %arg1: i32) -> (i32, i32) {
    %c0_i32 = arith.constant 0 : i32
    %c0_i32_0 = arith.constant 0 : i32
    %c0_i32_1 = arith.constant 0 : i32
    return %c0_i32, %c0_i32_0 : i32, i32
  }
  func.func @transform_6(%arg0: i32, %arg1: i32) -> (i32, i32) {
    %c0_i32 = arith.constant 0 : i32
    %c0_i32_0 = arith.constant 0 : i32
    %c0_i32_1 = arith.constant 0 : i32
    return %c0_i32, %c0_i32_0 : i32, i32
  }
  func.func @transform_7(%arg0: i32, %arg1: i32) -> (i32, i32, i32) {
    %c0_i32 = arith.constant 0 : i32
    %c0_i32_0 = arith.constant 0 : i32
    return %arg0, %c0_i32, %arg1 : i32, i32, i32
  }
}

module attributes {stable_mosaic.version = 11 : i64} {
  func.func @_mlp_kernel(%arg0: i32, %arg1: i32, %arg2: memref<1x4x16xf32, #tpu.memory_space<vmem>>, %arg3: memref<32x4xbf16, #tpu.memory_space<vmem>>, %arg4: memref<32x1xf32, #tpu.memory_space<vmem>>, %arg5: memref<64x32xbf16, #tpu.memory_space<vmem>>, %arg6: memref<64x1xf32, #tpu.memory_space<vmem>>, %arg7: memref<3x64xbf16, #tpu.memory_space<vmem>>, %arg8: memref<3x1xf32, #tpu.memory_space<vmem>>, %arg9: memref<1x3x16xf32, #tpu.memory_space<vmem>>) attributes {dimension_semantics = [#tpu.dimension_semantics<parallel>, #tpu.dimension_semantics<parallel>], iteration_bounds = array<i64: 2, 1>, scalar_prefetch = 0 : i64, scratch_operands = 0 : i64, tpu.core_type = #tpu.core_type<tc>, window_params = [{transform_indices = @transform_0, window_bounds = array<i64: 1, 4, 16>}, {pipeline_mode = #tpu.pipeline_mode<synchronous>, transform_indices = @transform_1, window_bounds = array<i64: 32, 4>}, {pipeline_mode = #tpu.pipeline_mode<synchronous>, transform_indices = @transform_2, window_bounds = array<i64: 32, 1>}, {pipeline_mode = #tpu.pipeline_mode<synchronous>, transform_indices = @transform_3, window_bounds = array<i64: 64, 32>}, {pipeline_mode = #tpu.pipeline_mode<synchronous>, transform_indices = @transform_4, window_bounds = array<i64: 64, 1>}, {pipeline_mode = #tpu.pipeline_mode<synchronous>, transform_indices = @transform_5, window_bounds = array<i64: 3, 64>}, {pipeline_mode = #tpu.pipeline_mode<synchronous>, transform_indices = @transform_6, window_bounds = array<i64: 3, 1>}, {transform_indices = @transform_7, window_bounds = array<i64: 1, 3, 16>}]} {
    %c0 = arith.constant 0 : index
    %c0_0 = arith.constant 0 : index
    %c0_1 = arith.constant 0 : index
    %0 = vector.load %arg2[%c0, %c0_0, %c0_1] : memref<1x4x16xf32, #tpu.memory_space<vmem>>, vector<1x4x16xf32>
    %1 = vector.shape_cast %0 : vector<1x4x16xf32> to vector<4x16xf32>
    %2 = arith.truncf %1 : vector<4x16xf32> to vector<4x16xbf16>
    %c0_2 = arith.constant 0 : index
    %c0_3 = arith.constant 0 : index
    %3 = vector.load %arg3[%c0_2, %c0_3] : memref<32x4xbf16, #tpu.memory_space<vmem>>, vector<32x4xbf16>
    %c0_4 = arith.constant 0 : index
    %c0_5 = arith.constant 0 : index
    %4 = vector.load %arg4[%c0_4, %c0_5] : memref<32x1xf32, #tpu.memory_space<vmem>>, vector<32x1xf32>
    %cst = arith.constant dense<0.000000e+00> : vector<32x16xf32>
    %5 = tpu.matmul %3, %2, %cst {dimension_numbers = #tpu.dot_dimension_numbers<[1], [0], [0], [1], [0, 0, 1, 1], [], []>} : vector<32x4xbf16>, vector<4x16xbf16>, vector<32x16xf32> -> vector<32x16xf32>
    %6 = vector.broadcast %4 : vector<32x1xf32> to vector<32x16xf32>
    %7 = arith.addf %5, %6 : vector<32x16xf32>
    %cst_6 = arith.constant 0.000000e+00 : f32
    %8 = vector.broadcast %cst_6 : f32 to vector<32x16xf32>
    %9 = arith.maximumf %7, %8 : vector<32x16xf32>
    %10 = arith.truncf %9 : vector<32x16xf32> to vector<32x16xbf16>
    %c0_7 = arith.constant 0 : index
    %c0_8 = arith.constant 0 : index
    %11 = vector.load %arg5[%c0_7, %c0_8] : memref<64x32xbf16, #tpu.memory_space<vmem>>, vector<64x32xbf16>
    %c0_9 = arith.constant 0 : index
    %c0_10 = arith.constant 0 : index
    %12 = vector.load %arg6[%c0_9, %c0_10] : memref<64x1xf32, #tpu.memory_space<vmem>>, vector<64x1xf32>
    %cst_11 = arith.constant dense<0.000000e+00> : vector<64x16xf32>
    %13 = tpu.matmul %11, %10, %cst_11 {dimension_numbers = #tpu.dot_dimension_numbers<[1], [0], [0], [1], [0, 0, 1, 1], [], []>} : vector<64x32xbf16>, vector<32x16xbf16>, vector<64x16xf32> -> vector<64x16xf32>
    %14 = vector.broadcast %12 : vector<64x1xf32> to vector<64x16xf32>
    %15 = arith.addf %13, %14 : vector<64x16xf32>
    %cst_12 = arith.constant 0.000000e+00 : f32
    %16 = vector.broadcast %cst_12 : f32 to vector<64x16xf32>
    %17 = arith.maximumf %15, %16 : vector<64x16xf32>
    %18 = arith.truncf %17 : vector<64x16xf32> to vector<64x16xbf16>
    %c0_13 = arith.constant 0 : index
    %c0_14 = arith.constant 0 : index
    %19 = vector.load %arg7[%c0_13, %c0_14] : memref<3x64xbf16, #tpu.memory_space<vmem>>, vector<3x64xbf16>
    %c0_15 = arith.constant 0 : index
    %c0_16 = arith.constant 0 : index
    %20 = vector.load %arg8[%c0_15, %c0_16] : memref<3x1xf32, #tpu.memory_space<vmem>>, vector<3x1xf32>
    %cst_17 = arith.constant dense<0.000000e+00> : vector<3x16xf32>
    %21 = tpu.matmul %19, %18, %cst_17 {dimension_numbers = #tpu.dot_dimension_numbers<[1], [0], [0], [1], [0, 0, 1, 1], [], []>} : vector<3x64xbf16>, vector<64x16xbf16>, vector<3x16xf32> -> vector<3x16xf32>
    %22 = vector.broadcast %20 : vector<3x1xf32> to vector<3x16xf32>
    %23 = arith.addf %21, %22 : vector<3x16xf32>
    %c0_18 = arith.constant 0 : index
    %c0_19 = arith.constant 0 : index
    %c0_20 = arith.constant 0 : index
    %24 = vector.load %arg9[%c0_18, %c0_19, %c0_20] : memref<1x3x16xf32, #tpu.memory_space<vmem>>, vector<1x3x16xf32>
    %25 = vector.shape_cast %24 : vector<1x3x16xf32> to vector<3x16xf32>
    %26 = vector.shape_cast %23 : vector<3x16xf32> to vector<1x3x16xf32>
    tpu.vector_store %arg9[%c0_18, %c0_19, %c0_20], %26 {strides = array<i32>} : memref<1x3x16xf32, #tpu.memory_space<vmem>>, vector<1x3x16xf32>,
    return
  }
  func.func @transform_0(%arg0: i32, %arg1: i32) -> (i32, i32, i32) {
    %c0_i32 = arith.constant 0 : i32
    %c0_i32_0 = arith.constant 0 : i32
    return %arg0, %c0_i32, %arg1 : i32, i32, i32
  }
  func.func @transform_1(%arg0: i32, %arg1: i32) -> (i32, i32) {
    %c0_i32 = arith.constant 0 : i32
    %c0_i32_0 = arith.constant 0 : i32
    %c0_i32_1 = arith.constant 0 : i32
    return %c0_i32, %c0_i32_0 : i32, i32
  }
  func.func @transform_2(%arg0: i32, %arg1: i32) -> (i32, i32) {
    %c0_i32 = arith.constant 0 : i32
    %c0_i32_0 = arith.constant 0 : i32
    %c0_i32_1 = arith.constant 0 : i32
    return %c0_i32, %c0_i32_0 : i32, i32
  }
  func.func @transform_3(%arg0: i32, %arg1: i32) -> (i32, i32) {
    %c0_i32 = arith.constant 0 : i32
    %c0_i32_0 = arith.constant 0 : i32
    %c0_i32_1 = arith.constant 0 : i32
    return %c0_i32, %c0_i32_0 : i32, i32
  }
  func.func @transform_4(%arg0: i32, %arg1: i32) -> (i32, i32) {
    %c0_i32 = arith.constant 0 : i32
    %c0_i32_0 = arith.constant 0 : i32
    %c0_i32_1 = arith.constant 0 : i32
    return %c0_i32, %c0_i32_0 : i32, i32
  }
  func.func @transform_5(%arg0: i32, %arg1: i32) -> (i32, i32) {
    %c0_i32 = arith.constant 0 : i32
    %c0_i32_0 = arith.constant 0 : i32
    %c0_i32_1 = arith.constant 0 : i32
    return %c0_i32, %c0_i32_0 : i32, i32
  }
  func.func @transform_6(%arg0: i32, %arg1: i32) -> (i32, i32) {
    %c0_i32 = arith.constant 0 : i32
    %c0_i32_0 = arith.constant 0 : i32
    %c0_i32_1 = arith.constant 0 : i32
    return %c0_i32, %c0_i32_0 : i32, i32
  }
  func.func @transform_7(%arg0: i32, %arg1: i32) -> (i32, i32, i32) {
    %c0_i32 = arith.constant 0 : i32
    %c0_i32_0 = arith.constant 0 : i32
    return %arg0, %c0_i32, %arg1 : i32, i32, i32
  }
}

</mosaic_0001>

<bundles_post_ra>
// kernel: tpu_custom_call.1
= control target key start
LH: loop header
LB: loop body
LE: loop exit
PB: predicated region body
PF: predicated region fallthrough
CT: control target
= control target key end

     0   :  { %s874_s24 = smov 0   ;;  %s876_s25 = smov 0   ;;  %s980_s0 = inlined_call_operand.vmem [shape: f32[2,4,16], index: 0, kind: input, shape index: {}]   ;;  %s981_s1 = inlined_call_operand.vmem [shape: bf16[32,4], index: 1, kind: input, shape index: {}]   ;;  %s982_s2 = inlined_call_operand.vmem [shape: f32[32,1], index: 2, kind: input, shape index: {}]   ;;  %s983_s3 = inlined_call_operand.vmem [shape: bf16[64,32], index: 3, kind: input, shape index: {}]   ;;  %s984_s4 = inlined_call_operand.vmem [shape: f32[64,1], index: 4, kind: input, shape index: {}]   ;;  %s985_s5 = inlined_call_operand.vmem [shape: bf16[3,64], index: 5, kind: input, shape index: {}]   ;;  %s986_s6 = inlined_call_operand.vmem [shape: f32[3,1], index: 6, kind: input, shape index: {}]   ;;  %s987_s7 = inlined_call_operand.vmem [shape: f32[2,3,16], index: 7, kind: output, shape index: {}]  }
   0x1   :  { %s878_s26 = smov 0  }
   0x2 LB: > { %s29_s27 = sadd.s32 1, %s825_s25  ;;  %p709_p0 = scmp.ge.s32.totalorder %s829_s26, 1  ;;  %s829_s26 = sphi %s878_s26, %s17_s26   ;;  %s825_s25 = sphi %s876_s25, %s989_s25   ;;  %s821_s24 = sphi %s874_s24, %s988_s24  }
   0x3   : > { %p31_p1 = scmp.ge.s32.totalorder %s29_s27, 2  ;;  %p255_p2 = scmp.lt.s32.totalorder %s829_s26, 3 }
   0x5   : > { %s991_s27 = smov (%p31_p1, %s29_s27), 0  ;;  %p256_p3 = pnand %p709_p0, %p255_p2 }
   0x6   : > { %p291_p4 = scmp.lt.s32.totalorder (!%p256_p3), %s821_s24, 1  ;;  %v801_v0 = vld [vmem:[%s981_s1] sm:$0xff] (!%p256_p3)   ;;  %vm346_vm0 = vcmask (!%p256_p3), 31744   ;;  %v831_v2 = vmov (!%p256_p3), 0   ;;  %v314_v3 = vld [vmem:[%s982_s2 + $0x10] sm:$0xff] (!%p256_p3)  ;;  %v313_v4 = vld [vmem:[%s982_s2 + $0x8] sm:$0xff] (!%p256_p3) }
   0x7   : > { %259 = sbr.rel (%p256_p3) target bundleno = 704 (0x2c0), region = 48  ;;  %v312_v1 = vld [vmem:[%s982_s2] sm:$0xff] (!%p256_p3)  ;;  %743 = vmatprep.mubr.msk.bf16.mxu0 (!%p256_p3), %vm346_vm0, %v801_v0  ;;  %799 = vset.pattern.permute.xlu0 (!%p256_p3), %v831_v2  ;;  %vm353_vm1 = vcmask (!%p256_p3), 1041408   ;;  %v315_v6 = vld [vmem:[%s982_s2 + $0x18] sm:$0xff] (!%p256_p3)  ;;  %v802_v8 = vld [vmem:[%s981_s1 + $0x8] sm:$0xff] (!%p256_p3)   ;;  %vm488_vm2 = vcmask (!%p256_p3), 261120  }
   0x8   : > { %318 = vperm.xlu0 (!%p256_p3), %799, %v312_v1   ;;  %800 = vset.pattern.permute.xlu1 (!%p256_p3), %v831_v2  ;;  %v420_v10 = vld [vmem:[%s984_s4] sm:$0xff] (!%p256_p3)  ;;  %v421_v11 = vld [vmem:[%s984_s4 + $0x8] sm:$0xff] (!%p256_p3)  ;;  %v422_v12 = vld [vmem:[%s984_s4 + $0x10] sm:$0xff] (!%p256_p3)  ;;  %v832_v41 = vmov (!%p256_p3), 0.0   ;;  %vm833_vm3 = vmmov (!%p256_p3), 0   ;;  %vm585_vm4 = vcmask (!%p256_p3), 523264  }
   0x9   : > { %328 = vperm.xlu1 (!%p256_p3), %800, %v314_v3   ;;  %v423_v13 = vld [vmem:[%s984_s4 + $0x18] sm:$0xff] (!%p256_p3)  ;;  %v424_v14 = vld [vmem:[%s984_s4 + $0x20] sm:$0xff] (!%p256_p3)  ;;  %v425_v15 = vld [vmem:[%s984_s4 + $0x28] sm:$0xff] (!%p256_p3)  ;;  %vm629_vm5 = vcmask (!%p256_p3), 124928  }
   0xa   : > { %v426_v16 = vld [vmem:[%s984_s4 + $0x30] sm:$0xff] (!%p256_p3)  ;;  %v427_v17 = vld [vmem:[%s984_s4 + $0x38] sm:$0xff] (!%p256_p3)  ;;  %v579_v18 = vld [vmem:[%s986_s6] sm:$0x7] (!%p256_p3) }
   0xb   : > { %v803_v19 = vld [vmem:[%s983_s3] sm:$0xff] (!%p256_p3)   ;;  %v804_v38 = vld [vmem:[%s983_s3 + $0x8] sm:$0xff] (!%p256_p3)   ;;  %v805_v39 = vld [vmem:[%s983_s3 + $0x10] sm:$0xff] (!%p256_p3)  }
   0xc   : > { %323 = vperm.xlu0 (!%p256_p3), %799, %v313_v4   ;;  %751 = vmatprep.mubr.msk.bf16.mxu1 (!%p256_p3), %vm488_vm2, %v803_v19  ;;  %v806_v40 = vld [vmem:[%s983_s3 + $0x18] sm:$0xff] (!%p256_p3)  }
   0xd   : > { %333 = vperm.xlu1 (!%p256_p3), %800, %v315_v6  }
   0xe   : > { %s993_s24 = smov (!%p291_p4, %s821_s24), 1 }
   0xf   : > { %s710_s11 = sshll.u32 %s993_s24, 2 }
  0x10   : > { %s297_s14 = scalar_lea.vmem %s980_s0, %s710_s11  ;;  %430 = vperm.xlu0 %799, %v420_v10   ;;  %s304_s15 = scalar_lea.vmem %s987_s7, %s710_s11 }
  0x11   : > { %v306_v5 = vld [vmem:[%s297_s14] sm:$0xf]  ;;  %435 = vperm.xlu1 %800, %v421_v11  }
  0x12   : > { %v307_v7 = vpack.c.bf16 %v306_v5, %v306_v5 }
  0x14   : > { %771 = vmatprep.subr.msk.bf16.mxu0 %vm353_vm1, %v307_v7  ;;  %v355_v9 = vsel %vm353_vm1, %v307_v7, 0  ;;  %440 = vperm.xlu0 %799, %v422_v12  }
  0x15   : > { %742 = vmatpush3.bf16.msra.mxu0 %v355_v9  ;;  %445 = vperm.xlu1 %800, %v423_v13  }
  0x16   : > { %759 = vmatprep.subr.bf16.mxu0 %v832_v41 }
  0x18   : > { %744 = vmatmul.mubr.msk.bf16.vlgmr.msra.gmra.mrb[0].mxu0 %vm346_vm0, %v802_v8  ;;  %450 = vperm.xlu0 %799, %v424_v14   ;;  %v578_v14 = vld [vmem:[%s985_s5] sm:$0x3] }
  0x19   : > { %455 = vperm.xlu1 %800, %v425_v15   ;;  %767 = vmatprep.mubr.msk.bf16.mxu0 %vm833_vm3, %v832_v41 }
  0x1c   : > { %460 = vperm.xlu0 %799, %v426_v16  }
  0x1d   : > { %465 = vperm.xlu1 %800, %v427_v17  }
  0x20   : > { %582 = vperm.xlu0 %799, %v579_v18  }
  0x87   : > { %v319_v21 = vpop.permute.xlu0 %318 }
  0x88   : > { %v329_v20 = vpop.permute.xlu1 %328 }
  0x8b   : > { %v324_v28 = vpop.permute.xlu0 %323 }
  0x8c   : > { %v334_v25 = vpop.permute.xlu1 %333 }
  0x8f   : > { %v431_v42 = vpop.permute.xlu0 %430 }
  0x90   : > { %v436_v43 = vpop.permute.xlu1 %435 }
  0x93   : > { %v441_v44 = vpop.permute.xlu0 %440 }
  0x94   : > { %v446_v45 = vpop.permute.xlu1 %445 }
  0x97   : > { %v451_v49 = vpop.permute.xlu0 %450 }
  0x98   : > { %v456_v54 = vpop.permute.xlu1 %455 }
  0x9b   : > { %v461_v61 = vpop.permute.xlu0 %460 }
  0x9c   : > { %v466_v2 = vpop.permute.xlu1 %465 }
  0x9f   : > { %v583_v15 = vpop.permute.xlu0 %582 }
  0xeb   : > { %v745_v22 = vpop.f32.mrb[0].mxu0 }
  0xec   : > { %v400_v23 = vadd.f32 %v745_v22, %v329_v20  ;;  %v391_v24 = vpop.f32.mrb[1].mxu0 }
  0xed   : > { %v392_v26 = vadd.f32 %v391_v24, %v319_v21  ;;  %v746_v27 = vpop.f32.mrb[2].mxu0 }
  0xee   : > { %v403_v29 = vadd.f32 %v746_v27, %v334_v25  ;;  %v394_v30 = vpop.f32.mrb[3].mxu0  ;;  %v408_v32 = vmax.f32 %v400_v23, 0.0 }
  0xef   : > { %v395_v31 = vadd.f32 %v394_v30, %v324_v28  ;;  %v406_v34 = vmax.f32 %v392_v26, 0.0 }
  0xf0   : > { %v409_v33 = vmax.f32 %v403_v29, 0.0 }
  0xf1   : > { %v407_v35 = vmax.f32 %v395_v31, 0.0 }
  0xf2   : > { %v411_v36 = vpack.c.bf16 %v409_v33, %v408_v32 }
  0xf3   : > { %v410_v37 = vpack.c.bf16 %v407_v35, %v406_v34 }
  0xf5   : > { %747 = vmatprep.subr.bf16.mxu1 %v410_v37 }
  0xf6   : > { %748 = vmatpush3.bf16.msra.mxu1 %v410_v37 }
  0xf7   : > { %749 = vmatprep.subr.bf16.mxu1 %v411_v36 }
  0xfa   : > { %750 = vmatpush3.bf16.msra.mxu1 %v411_v36 }
  0xfd   : > { %752 = vmatmul.mubr.msk.bf16.vlgmr.msra.gmra.mrb[0].mxu1 %vm488_vm2, %v804_v38 }
  0xfe   : > { %755 = vmatprep.mubr.msk.bf16.mxu1 %vm488_vm2, %v805_v39 }
 0x105   : > { %756 = vmatmul.mubr.msk.bf16.gmra.mrb[4].mxu1 %vm488_vm2, %v806_v40 }
 0x1d0   : > { %v753_v46 = vpop.f32.mrb[0].mxu1 }
 0x1d1   : > { %v544_v47 = vadd.f32 %v753_v46, %v441_v44  ;;  %v535_v48 = vpop.f32.mrb[1].mxu1 }
 0x1d2   : > { %v536_v50 = vadd.f32 %v535_v48, %v431_v42  ;;  %v754_v51 = vpop.f32.mrb[2].mxu1 }
 0x1d3   : > { %v547_v52 = vadd.f32 %v754_v51, %v446_v45  ;;  %v538_v53 = vpop.f32.mrb[3].mxu1  ;;  %v568_v56 = vmax.f32 %v544_v47, 0.0 }
 0x1d4   : > { %v539_v55 = vadd.f32 %v538_v53, %v436_v43  ;;  %v566_v58 = vmax.f32 %v536_v50, 0.0 }
 0x1d5   : > { %v569_v57 = vmax.f32 %v547_v52, 0.0 }
 0x1d6   : > { %v567_v59 = vmax.f32 %v539_v55, 0.0 }
 0x1d7   : > { %v575_v60 = vpack.c.bf16 %v569_v57, %v568_v56 }
 0x1d8   : > { %v574_v62 = vpack.c.bf16 %v567_v59, %v566_v58  ;;  %v757_v63 = vpop.f32.mrb[4].mxu1 }
 0x1d9   : > { %v560_v0 = vadd.f32 %v757_v63, %v461_v61  ;;  %v551_v1 = vpop.f32.mrb[5].mxu1 }
 0x1da   : > { %v552_v3 = vadd.f32 %v551_v1, %v451_v49  ;;  %v758_v4 = vpop.f32.mrb[6].mxu1  ;;  %760 = vmatpush3.bf16.msra.mxu0 %v574_v62 }
 0x1db   : > { %v563_v5 = vadd.f32 %v758_v4, %v466_v2  ;;  %v554_v6 = vpop.f32.mrb[7].mxu1  ;;  %761 = vmatprep.subr.bf16.mxu0 %v832_v41  ;;  %v572_v8 = vmax.f32 %v560_v0, 0.0 }
 0x1dc   : > { %v555_v7 = vadd.f32 %v554_v6, %v456_v54  ;;  %v570_v10 = vmax.f32 %v552_v3, 0.0 }
 0x1dd   : > { %v573_v9 = vmax.f32 %v563_v5, 0.0 }
 0x1de   : > { %v571_v11 = vmax.f32 %v555_v7, 0.0  ;;  %762 = vmatpush3.bf16.msra.mxu0 %v575_v60 }
 0x1df   : > { %v577_v12 = vpack.c.bf16 %v573_v9, %v572_v8  ;;  %763 = vmatprep.subr.bf16.mxu0 %v832_v41 }
 0x1e0   : > { %v576_v13 = vpack.c.bf16 %v571_v11, %v570_v10 }
 0x1e2   : > { %764 = vmatpush3.bf16.msra.mxu0 %v576_v13 }
 0x1e3   : > { %765 = vmatprep.subr.bf16.mxu0 %v832_v41 }
 0x1e6   : > { %766 = vmatpush3.bf16.msra.mxu0 %v577_v12 }
 0x1e9   : > { %768 = vmatmul.mubr.msk.bf16.vlgmr.msra.gmra.mrb[4].mxu0 %vm585_vm4, %v578_v14 }
 0x2bc   : > { %v623_v16 = vpop.f32.mrb[4].mxu0 }
 0x2bd   : > { %v624_v17 = vadd.f32 %v623_v16, %v583_v15  ;;  %v769_v18 = vpop.f32.mrb[5].mxu0 }
 0x2be   : > { %v626_v19 = vpop.f32.mrb[6].mxu0 }
 0x2bf   : > { %630 = vst.msk [vmem:[%s304_s15] sm:$0x7] %vm629_vm5, %v624_v17  ;;  %v770_v20 = vpop.f32.mrb[7].mxu0 }
 0x2c0 PF: > { %s17_s26 = sadd.s32 1, %s829_s26   ;;  %s988_s24 = smov %s825_s25 }
 0x2c1   : > { %p14_p5 = scmp.ge.s32.totalorder %s17_s26, 4   ;;  %s989_s25 = smov %s991_s27 }
 0x2c3   :  { %16 = sbr.rel (!%p14_p5) target bundleno = 2 (0x2), region = 78 }

// kernel: tpu_custom_call.1
= control target key start
LH: loop header
LB: loop body
LE: loop exit
PB: predicated region body
PF: predicated region fallthrough
CT: control target
= control target key end

     0   :  { %s874_s24 = smov 0   ;;  %s876_s25 = smov 0   ;;  %s980_s0 = inlined_call_operand.vmem [shape: f32[2,4,16], index: 0, kind: input, shape index: {}]   ;;  %s981_s1 = inlined_call_operand.vmem [shape: bf16[32,4], index: 1, kind: input, shape index: {}]   ;;  %s982_s2 = inlined_call_operand.vmem [shape: f32[32,1], index: 2, kind: input, shape index: {}]   ;;  %s983_s3 = inlined_call_operand.vmem [shape: bf16[64,32], index: 3, kind: input, shape index: {}]   ;;  %s984_s4 = inlined_call_operand.vmem [shape: f32[64,1], index: 4, kind: input, shape index: {}]   ;;  %s985_s5 = inlined_call_operand.vmem [shape: bf16[3,64], index: 5, kind: input, shape index: {}]   ;;  %s986_s6 = inlined_call_operand.vmem [shape: f32[3,1], index: 6, kind: input, shape index: {}]   ;;  %s987_s7 = inlined_call_operand.vmem [shape: f32[2,3,16], index: 7, kind: output, shape index: {}]  }
   0x1   :  { %s878_s26 = smov 0  }
   0x2 LB: > { %s29_s27 = sadd.s32 1, %s825_s25  ;;  %p709_p0 = scmp.ge.s32.totalorder %s829_s26, 1  ;;  %s829_s26 = sphi %s878_s26, %s17_s26   ;;  %s825_s25 = sphi %s876_s25, %s989_s25   ;;  %s821_s24 = sphi %s874_s24, %s988_s24  }
   0x3   : > { %p31_p1 = scmp.ge.s32.totalorder %s29_s27, 2  ;;  %p255_p2 = scmp.lt.s32.totalorder %s829_s26, 3 }
   0x5   : > { %s991_s27 = smov (%p31_p1, %s29_s27), 0  ;;  %p256_p3 = pnand %p709_p0, %p255_p2 }
   0x6   : > { %p291_p4 = scmp.lt.s32.totalorder (!%p256_p3), %s821_s24, 1  ;;  %v801_v0 = vld [vmem:[%s981_s1] sm:$0xff] (!%p256_p3)   ;;  %vm346_vm0 = vcmask (!%p256_p3), 31744   ;;  %v831_v2 = vmov (!%p256_p3), 0   ;;  %v314_v3 = vld [vmem:[%s982_s2 + $0x10] sm:$0xff] (!%p256_p3)  ;;  %v313_v4 = vld [vmem:[%s982_s2 + $0x8] sm:$0xff] (!%p256_p3) }
   0x7   : > { %259 = sbr.rel (%p256_p3) target bundleno = 704 (0x2c0), region = 48  ;;  %v312_v1 = vld [vmem:[%s982_s2] sm:$0xff] (!%p256_p3)  ;;  %743 = vmatprep.mubr.msk.bf16.mxu0 (!%p256_p3), %vm346_vm0, %v801_v0  ;;  %799 = vset.pattern.permute.xlu0 (!%p256_p3), %v831_v2  ;;  %vm353_vm1 = vcmask (!%p256_p3), 1041408   ;;  %v315_v6 = vld [vmem:[%s982_s2 + $0x18] sm:$0xff] (!%p256_p3)  ;;  %v802_v8 = vld [vmem:[%s981_s1 + $0x8] sm:$0xff] (!%p256_p3)   ;;  %vm488_vm2 = vcmask (!%p256_p3), 261120  }
   0x8   : > { %318 = vperm.xlu0 (!%p256_p3), %799, %v312_v1   ;;  %800 = vset.pattern.permute.xlu1 (!%p256_p3), %v831_v2  ;;  %v420_v10 = vld [vmem:[%s984_s4] sm:$0xff] (!%p256_p3)  ;;  %v421_v11 = vld [vmem:[%s984_s4 + $0x8] sm:$0xff] (!%p256_p3)  ;;  %v422_v12 = vld [vmem:[%s984_s4 + $0x10] sm:$0xff] (!%p256_p3)  ;;  %v832_v41 = vmov (!%p256_p3), 0.0   ;;  %vm833_vm3 = vmmov (!%p256_p3), 0   ;;  %vm585_vm4 = vcmask (!%p256_p3), 523264  }
   0x9   : > { %328 = vperm.xlu1 (!%p256_p3), %800, %v314_v3   ;;  %v423_v13 = vld [vmem:[%s984_s4 + $0x18] sm:$0xff] (!%p256_p3)  ;;  %v424_v14 = vld [vmem:[%s984_s4 + $0x20] sm:$0xff] (!%p256_p3)  ;;  %v425_v15 = vld [vmem:[%s984_s4 + $0x28] sm:$0xff] (!%p256_p3)  ;;  %vm629_vm5 = vcmask (!%p256_p3), 124928  }
   0xa   : > { %v426_v16 = vld [vmem:[%s984_s4 + $0x30] sm:$0xff] (!%p256_p3)  ;;  %v427_v17 = vld [vmem:[%s984_s4 + $0x38] sm:$0xff] (!%p256_p3)  ;;  %v579_v18 = vld [vmem:[%s986_s6] sm:$0x7] (!%p256_p3) }
   0xb   : > { %v803_v19 = vld [vmem:[%s983_s3] sm:$0xff] (!%p256_p3)   ;;  %v804_v38 = vld [vmem:[%s983_s3 + $0x8] sm:$0xff] (!%p256_p3)   ;;  %v805_v39 = vld [vmem:[%s983_s3 + $0x10] sm:$0xff] (!%p256_p3)  }
   0xc   : > { %323 = vperm.xlu0 (!%p256_p3), %799, %v313_v4   ;;  %751 = vmatprep.mubr.msk.bf16.mxu1 (!%p256_p3), %vm488_vm2, %v803_v19  ;;  %v806_v40 = vld [vmem:[%s983_s3 + $0x18] sm:$0xff] (!%p256_p3)  }
   0xd   : > { %333 = vperm.xlu1 (!%p256_p3), %800, %v315_v6  }
   0xe   : > { %s993_s24 = smov (!%p291_p4, %s821_s24), 1 }
   0xf   : > { %s710_s11 = sshll.u32 %s993_s24, 2 }
  0x10   : > { %s297_s14 = scalar_lea.vmem %s980_s0, %s710_s11  ;;  %430 = vperm.xlu0 %799, %v420_v10   ;;  %s304_s15 = scalar_lea.vmem %s987_s7, %s710_s11 }
  0x11   : > { %v306_v5 = vld [vmem:[%s297_s14] sm:$0xf]  ;;  %435 = vperm.xlu1 %800, %v421_v11  }
  0x12   : > { %v307_v7 = vpack.c.bf16 %v306_v5, %v306_v5 }
  0x14   : > { %771 = vmatprep.subr.msk.bf16.mxu0 %vm353_vm1, %v307_v7  ;;  %v355_v9 = vsel %vm353_vm1, %v307_v7, 0  ;;  %440 = vperm.xlu0 %799, %v422_v12  }
  0x15   : > { %742 = vmatpush3.bf16.msra.mxu0 %v355_v9  ;;  %445 = vperm.xlu1 %800, %v423_v13  }
  0x16   : > { %759 = vmatprep.subr.bf16.mxu0 %v832_v41 }
  0x18   : > { %744 = vmatmul.mubr.msk.bf16.vlgmr.msra.gmra.mrb[0].mxu0 %vm346_vm0, %v802_v8  ;;  %450 = vperm.xlu0 %799, %v424_v14   ;;  %v578_v14 = vld [vmem:[%s985_s5] sm:$0x3] }
  0x19   : > { %455 = vperm.xlu1 %800, %v425_v15   ;;  %767 = vmatprep.mubr.msk.bf16.mxu0 %vm833_vm3, %v832_v41 }
  0x1c   : > { %460 = vperm.xlu0 %799, %v426_v16  }
  0x1d   : > { %465 = vperm.xlu1 %800, %v427_v17  }
  0x20   : > { %582 = vperm.xlu0 %799, %v579_v18  }
  0x87   : > { %v319_v21 = vpop.permute.xlu0 %318 }
  0x88   : > { %v329_v20 = vpop.permute.xlu1 %328 }
  0x8b   : > { %v324_v28 = vpop.permute.xlu0 %323 }
  0x8c   : > { %v334_v25 = vpop.permute.xlu1 %333 }
  0x8f   : > { %v431_v42 = vpop.permute.xlu0 %430 }
  0x90   : > { %v436_v43 = vpop.permute.xlu1 %435 }
  0x93   : > { %v441_v44 = vpop.permute.xlu0 %440 }
  0x94   : > { %v446_v45 = vpop.permute.xlu1 %445 }
  0x97   : > { %v451_v49 = vpop.permute.xlu0 %450 }
  0x98   : > { %v456_v54 = vpop.permute.xlu1 %455 }
  0x9b   : > { %v461_v61 = vpop.permute.xlu0 %460 }
  0x9c   : > { %v466_v2 = vpop.permute.xlu1 %465 }
  0x9f   : > { %v583_v15 = vpop.permute.xlu0 %582 }
  0xeb   : > { %v745_v22 = vpop.f32.mrb[0].mxu0 }
  0xec   : > { %v400_v23 = vadd.f32 %v745_v22, %v329_v20  ;;  %v391_v24 = vpop.f32.mrb[1].mxu0 }
  0xed   : > { %v392_v26 = vadd.f32 %v391_v24, %v319_v21  ;;  %v746_v27 = vpop.f32.mrb[2].mxu0 }
  0xee   : > { %v403_v29 = vadd.f32 %v746_v27, %v334_v25  ;;  %v394_v30 = vpop.f32.mrb[3].mxu0  ;;  %v408_v32 = vmax.f32 %v400_v23, 0.0 }
  0xef   : > { %v395_v31 = vadd.f32 %v394_v30, %v324_v28  ;;  %v406_v34 = vmax.f32 %v392_v26, 0.0 }
  0xf0   : > { %v409_v33 = vmax.f32 %v403_v29, 0.0 }
  0xf1   : > { %v407_v35 = vmax.f32 %v395_v31, 0.0 }
  0xf2   : > { %v411_v36 = vpack.c.bf16 %v409_v33, %v408_v32 }
  0xf3   : > { %v410_v37 = vpack.c.bf16 %v407_v35, %v406_v34 }
  0xf5   : > { %747 = vmatprep.subr.bf16.mxu1 %v410_v37 }
  0xf6   : > { %748 = vmatpush3.bf16.msra.mxu1 %v410_v37 }
  0xf7   : > { %749 = vmatprep.subr.bf16.mxu1 %v411_v36 }
  0xfa   : > { %750 = vmatpush3.bf16.msra.mxu1 %v411_v36 }
  0xfd   : > { %752 = vmatmul.mubr.msk.bf16.vlgmr.msra.gmra.mrb[0].mxu1 %vm488_vm2, %v804_v38 }
  0xfe   : > { %755 = vmatprep.mubr.msk.bf16.mxu1 %vm488_vm2, %v805_v39 }
 0x105   : > { %756 = vmatmul.mubr.msk.bf16.gmra.mrb[4].mxu1 %vm488_vm2, %v806_v40 }
 0x1d0   : > { %v753_v46 = vpop.f32.mrb[0].mxu1 }
 0x1d1   : > { %v544_v47 = vadd.f32 %v753_v46, %v441_v44  ;;  %v535_v48 = vpop.f32.mrb[1].mxu1 }
 0x1d2   : > { %v536_v50 = vadd.f32 %v535_v48, %v431_v42  ;;  %v754_v51 = vpop.f32.mrb[2].mxu1 }
 0x1d3   : > { %v547_v52 = vadd.f32 %v754_v51, %v446_v45  ;;  %v538_v53 = vpop.f32.mrb[3].mxu1  ;;  %v568_v56 = vmax.f32 %v544_v47, 0.0 }
 0x1d4   : > { %v539_v55 = vadd.f32 %v538_v53, %v436_v43  ;;  %v566_v58 = vmax.f32 %v536_v50, 0.0 }
 0x1d5   : > { %v569_v57 = vmax.f32 %v547_v52, 0.0 }
 0x1d6   : > { %v567_v59 = vmax.f32 %v539_v55, 0.0 }
 0x1d7   : > { %v575_v60 = vpack.c.bf16 %v569_v57, %v568_v56 }
 0x1d8   : > { %v574_v62 = vpack.c.bf16 %v567_v59, %v566_v58  ;;  %v757_v63 = vpop.f32.mrb[4].mxu1 }
 0x1d9   : > { %v560_v0 = vadd.f32 %v757_v63, %v461_v61  ;;  %v551_v1 = vpop.f32.mrb[5].mxu1 }
 0x1da   : > { %v552_v3 = vadd.f32 %v551_v1, %v451_v49  ;;  %v758_v4 = vpop.f32.mrb[6].mxu1  ;;  %760 = vmatpush3.bf16.msra.mxu0 %v574_v62 }
 0x1db   : > { %v563_v5 = vadd.f32 %v758_v4, %v466_v2  ;;  %v554_v6 = vpop.f32.mrb[7].mxu1  ;;  %761 = vmatprep.subr.bf16.mxu0 %v832_v41  ;;  %v572_v8 = vmax.f32 %v560_v0, 0.0 }
 0x1dc   : > { %v555_v7 = vadd.f32 %v554_v6, %v456_v54  ;;  %v570_v10 = vmax.f32 %v552_v3, 0.0 }
 0x1dd   : > { %v573_v9 = vmax.f32 %v563_v5, 0.0 }
 0x1de   : > { %v571_v11 = vmax.f32 %v555_v7, 0.0  ;;  %762 = vmatpush3.bf16.msra.mxu0 %v575_v60 }
 0x1df   : > { %v577_v12 = vpack.c.bf16 %v573_v9, %v572_v8  ;;  %763 = vmatprep.subr.bf16.mxu0 %v832_v41 }
 0x1e0   : > { %v576_v13 = vpack.c.bf16 %v571_v11, %v570_v10 }
 0x1e2   : > { %764 = vmatpush3.bf16.msra.mxu0 %v576_v13 }
 0x1e3   : > { %765 = vmatprep.subr.bf16.mxu0 %v832_v41 }
 0x1e6   : > { %766 = vmatpush3.bf16.msra.mxu0 %v577_v12 }
 0x1e9   : > { %768 = vmatmul.mubr.msk.bf16.vlgmr.msra.gmra.mrb[4].mxu0 %vm585_vm4, %v578_v14 }
 0x2bc   : > { %v623_v16 = vpop.f32.mrb[4].mxu0 }
 0x2bd   : > { %v624_v17 = vadd.f32 %v623_v16, %v583_v15  ;;  %v769_v18 = vpop.f32.mrb[5].mxu0 }
 0x2be   : > { %v626_v19 = vpop.f32.mrb[6].mxu0 }
 0x2bf   : > { %630 = vst.msk [vmem:[%s304_s15] sm:$0x7] %vm629_vm5, %v624_v17  ;;  %v770_v20 = vpop.f32.mrb[7].mxu0 }
 0x2c0 PF: > { %s17_s26 = sadd.s32 1, %s829_s26   ;;  %s988_s24 = smov %s825_s25 }
 0x2c1   : > { %p14_p5 = scmp.ge.s32.totalorder %s17_s26, 4   ;;  %s989_s25 = smov %s991_s27 }
 0x2c3   :  { %16 = sbr.rel (!%p14_p5) target bundleno = 2 (0x2), region = 78 }

</bundles_post_ra>
